<compile_context>
chip_gen: v7x
topology: tpu7x:2x2x1
jax: 0.10.0
libtpu: 0.0.40
codegen_flags: <defaults>
</compile_context>

<pallas_src>
import jax
import jax.numpy as jnp
from jax.experimental import pallas as pl
from jax.experimental.pallas import tpu as pltpu

HIDDEN1 = 128
HIDDEN2 = 64
OUT_PAD = 128  # lane-dense padded fc3 output width


def actor_kernel(x_ref, w1_ref, b1_ref, w2_ref, b2_ref, w3_ref, b3_ref, o_ref):
    # Matmuls on the MXU (inputs may be f32 or bf16); bias/ReLU/tanh in f32.
    x = x_ref[...]

    h1 = jnp.dot(x, w1_ref[...], preferred_element_type=jnp.float32) + b1_ref[...]
    h1 = jnp.maximum(h1, 0.0)

    h2 = (jnp.dot(h1.astype(w2_ref.dtype), w2_ref[...],
                  preferred_element_type=jnp.float32) + b2_ref[...])
    h2 = jnp.maximum(h2, 0.0)

    h3 = (jnp.dot(h2.astype(w3_ref.dtype), w3_ref[...],
                  preferred_element_type=jnp.float32) + b3_ref[...])
    # Full 128-lane store (no masked partial stores) thanks to OUT_PAD padding.
    o_ref[...] = jnp.tanh(h3).astype(o_ref.dtype)


def _round_up(n, m):
    return ((n + m - 1) // m) * m


def actor_forward(x, params, *, tile_b=1024):
    """x: [B, in_dims] float32. params: dict from init_actor_params."""
    w1, b1 = params["w1"], params["b1"]
    w2, b2 = params["w2"], params["b2"]
    w3, b3 = params["w3"], params["b3"]  # already zero-padded to OUT_PAD cols
    out_dims = params["out_dims"]

    B, in_dims = x.shape

    # Big batch tiles amortize per-grid-step overhead; keep the tile a multiple
    # of the sublane pack (8 for f32, 16 for bf16). Clamp for small batches.
    mult = 16 if w1.dtype == jnp.bfloat16 else 8
    tb = min(_round_up(tile_b, mult), _round_up(B, mult))
    B_pad = _round_up(B, tb)
    if B_pad != B:
        x = jnp.pad(x, ((0, B_pad - B), (0, 0)))
    x = x.astype(w1.dtype)  # feed the MXU in the weights' dtype (f32 or bf16)

    grid = (B_pad // tb,)

    def const(arr):
        # Constant index_map -> block stays VMEM-resident across grid steps.
        return pl.BlockSpec(arr.shape, lambda i: (0,) * arr.ndim)

    flops = 2 * B_pad * (in_dims * HIDDEN1 + HIDDEN1 * HIDDEN2 + HIDDEN2 * OUT_PAD)
    bytes_accessed = (
        x.size * x.dtype.itemsize
        + sum(int(a.size) * a.dtype.itemsize for a in (w1, b1, w2, b2, w3, b3))
        + B_pad * OUT_PAD * 4
    )

    out = pl.pallas_call(
        actor_kernel,
        out_shape=jax.ShapeDtypeStruct((B_pad, OUT_PAD), jnp.float32),
        grid=grid,
        in_specs=[
            pl.BlockSpec((tb, in_dims), lambda i: (i, 0)),  # batch-tiled input
            const(w1), const(b1), const(w2), const(b2), const(w3), const(b3),
        ],
        out_specs=pl.BlockSpec((tb, OUT_PAD), lambda i: (i, 0)),
        compiler_params=pltpu.CompilerParams(
            dimension_semantics=("parallel",),  # 2 TCs on v7x; harmless elsewhere
        ),
        cost_estimate=pl.CostEstimate(
            flops=flops,
            transcendentals=B_pad * OUT_PAD,
            bytes_accessed=bytes_accessed,
        ),
    )(x, w1, b1, w2, b2, w3, b3)

    # Undo batch padding and lane padding outside the kernel.
    return out[:B, :out_dims]


def init_actor_params(key, in_dims, out_dims, dtype=jnp.float32):
    """PyTorch nn.Linear-style init (U[-1/sqrt(fan_in), +1/sqrt(fan_in)]).

    Weights are stored transposed ([in, out]) so the kernel computes x @ W + b,
    matching nn.Linear(x) = x @ W.T + b. fc3 is zero-padded to OUT_PAD columns
    for lane-dense stores. Biases stay f32 (elementwise math stays f32).
    `dtype` may be jnp.bfloat16 to halve HBM traffic of weights/activations.
    """
    def linear(key, fan_in, fan_out):
        kw, kb = jax.random.split(key)
        bound = 1.0 / jnp.sqrt(fan_in)
        w = jax.random.uniform(kw, (fan_in, fan_out), jnp.float32, -bound, bound)
        b = jax.random.uniform(kb, (1, fan_out), jnp.float32, -bound, bound)
        return w, b

    k1, k2, k3 = jax.random.split(key, 3)
    w1, b1 = linear(k1, in_dims, HIDDEN1)
    w2, b2 = linear(k2, HIDDEN1, HIDDEN2)
    w3, b3 = linear(k3, HIDDEN2, out_dims)

    w3p = jnp.zeros((HIDDEN2, OUT_PAD), jnp.float32).at[:, :out_dims].set(w3)
    b3p = jnp.zeros((1, OUT_PAD), jnp.float32).at[:, :out_dims].set(b3)

    return {
        "w1": w1.astype(dtype), "b1": b1,
        "w2": w2.astype(dtype), "b2": b2,
        "w3": w3p.astype(dtype), "b3": b3p,
        "out_dims": out_dims,
    }


def actor_reference(x, p):
    h1 = jnp.maximum(x @ p["w1"].astype(jnp.float32) + p["b1"], 0.0)
    h2 = jnp.maximum(h1 @ p["w2"].astype(jnp.float32) + p["b2"], 0.0)
    h3 = jnp.tanh(h2 @ p["w3"].astype(jnp.float32) + p["b3"])
    return h3[:, :p["out_dims"]]


if __name__ == "__main__":
    key = jax.random.PRNGKey(0)
    kx, kp, kx2 = jax.random.split(key, 3)

    in_dims, out_dims = 16, 4
    params = init_actor_params(kp, in_dims, out_dims)

    # Small-batch check (matches the original toy sizes).
    batch = 8
    x = jax.random.normal(kx, (batch, in_dims), jnp.float32)
    out = jax.block_until_ready(actor_forward(x, params))
    ref = actor_reference(x, params)
    assert out.shape == (batch, out_dims)
    assert jnp.allclose(out, ref, atol=1e-5, rtol=1e-5)

    # Larger, non-multiple batch to exercise the batch grid + padding path.
    batch2 = 1000
    x2 = jax.random.normal(kx2, (batch2, in_dims), jnp.float32)
    out2 = jax.block_until_ready(actor_forward(x2, params, tile_b=256))
    ref2 = actor_reference(x2, params)
    assert out2.shape == (batch2, out_dims)
    assert jnp.allclose(out2, ref2, atol=1e-5, rtol=1e-5)

    print("KERNEL_OK")
</pallas_src>

<mosaic_0001>
module attributes {stable_mosaic.version = 11 : i64} {
  func.func @actor_kernel(%arg0: i32, %arg1: memref<8x16xf32, #tpu.memory_space<vmem>>, %arg2: memref<16x128xf32, #tpu.memory_space<vmem>>, %arg3: memref<1x128xf32, #tpu.memory_space<vmem>>, %arg4: memref<128x64xf32, #tpu.memory_space<vmem>>, %arg5: memref<1x64xf32, #tpu.memory_space<vmem>>, %arg6: memref<64x128xf32, #tpu.memory_space<vmem>>, %arg7: memref<1x128xf32, #tpu.memory_space<vmem>>, %arg8: memref<8x128xf32, #tpu.memory_space<vmem>>) attributes {dimension_semantics = [#tpu.dimension_semantics<parallel>], iteration_bounds = array<i64: 1>, scalar_prefetch = 0 : i64, scratch_operands = 0 : i64, tpu.core_type = #tpu.core_type<tc>, window_params = [{transform_indices = @transform_0, window_bounds = array<i64: 8, 16>}, {pipeline_mode = #tpu.pipeline_mode<synchronous>, transform_indices = @transform_1, window_bounds = array<i64: 16, 128>}, {pipeline_mode = #tpu.pipeline_mode<synchronous>, transform_indices = @transform_2, window_bounds = array<i64: 1, 128>}, {pipeline_mode = #tpu.pipeline_mode<synchronous>, transform_indices = @transform_3, window_bounds = array<i64: 128, 64>}, {pipeline_mode = #tpu.pipeline_mode<synchronous>, transform_indices = @transform_4, window_bounds = array<i64: 1, 64>}, {pipeline_mode = #tpu.pipeline_mode<synchronous>, transform_indices = @transform_5, window_bounds = array<i64: 64, 128>}, {pipeline_mode = #tpu.pipeline_mode<synchronous>, transform_indices = @transform_6, window_bounds = array<i64: 1, 128>}, {transform_indices = @transform_7, window_bounds = array<i64: 8, 128>}]} {
    %c0 = arith.constant 0 : index
    %c0_0 = arith.constant 0 : index
    %0 = vector.load %arg1[%c0, %c0_0] : memref<8x16xf32, #tpu.memory_space<vmem>>, vector<8x16xf32>
    %c0_1 = arith.constant 0 : index
    %c0_2 = arith.constant 0 : index
    %1 = vector.load %arg2[%c0_1, %c0_2] : memref<16x128xf32, #tpu.memory_space<vmem>>, vector<16x128xf32>
    %cst = arith.constant dense<0.000000e+00> : vector<8x128xf32>
    %2 = tpu.matmul %0, %1, %cst {dimension_numbers = #tpu.dot_dimension_numbers<[1], [0], [0], [1], [0, 0, 1, 1], [], []>} : vector<8x16xf32>, vector<16x128xf32>, vector<8x128xf32> -> vector<8x128xf32>
    %c0_3 = arith.constant 0 : index
    %c0_4 = arith.constant 0 : index
    %3 = vector.load %arg3[%c0_3, %c0_4] : memref<1x128xf32, #tpu.memory_space<vmem>>, vector<1x128xf32>
    %4 = vector.broadcast %3 : vector<1x128xf32> to vector<8x128xf32>
    %5 = arith.addf %2, %4 : vector<8x128xf32>
    %cst_5 = arith.constant 0.000000e+00 : f32
    %6 = vector.broadcast %cst_5 : f32 to vector<8x128xf32>
    %7 = arith.maximumf %5, %6 : vector<8x128xf32>
    %c0_6 = arith.constant 0 : index
    %c0_7 = arith.constant 0 : index
    %8 = vector.load %arg4[%c0_6, %c0_7] : memref<128x64xf32, #tpu.memory_space<vmem>>, vector<128x64xf32>
    %cst_8 = arith.constant dense<0.000000e+00> : vector<8x64xf32>
    %9 = tpu.matmul %7, %8, %cst_8 {dimension_numbers = #tpu.dot_dimension_numbers<[1], [0], [0], [1], [0, 0, 1, 1], [], []>} : vector<8x128xf32>, vector<128x64xf32>, vector<8x64xf32> -> vector<8x64xf32>
    %c0_9 = arith.constant 0 : index
    %c0_10 = arith.constant 0 : index
    %10 = vector.load %arg5[%c0_9, %c0_10] : memref<1x64xf32, #tpu.memory_space<vmem>>, vector<1x64xf32>
    %11 = vector.broadcast %10 : vector<1x64xf32> to vector<8x64xf32>
    %12 = arith.addf %9, %11 : vector<8x64xf32>
    %cst_11 = arith.constant 0.000000e+00 : f32
    %13 = vector.broadcast %cst_11 : f32 to vector<8x64xf32>
    %14 = arith.maximumf %12, %13 : vector<8x64xf32>
    %c0_12 = arith.constant 0 : index
    %c0_13 = arith.constant 0 : index
    %15 = vector.load %arg6[%c0_12, %c0_13] : memref<64x128xf32, #tpu.memory_space<vmem>>, vector<64x128xf32>
    %cst_14 = arith.constant dense<0.000000e+00> : vector<8x128xf32>
    %16 = tpu.matmul %14, %15, %cst_14 {dimension_numbers = #tpu.dot_dimension_numbers<[1], [0], [0], [1], [0, 0, 1, 1], [], []>} : vector<8x64xf32>, vector<64x128xf32>, vector<8x128xf32> -> vector<8x128xf32>
    %c0_15 = arith.constant 0 : index
    %c0_16 = arith.constant 0 : index
    %17 = vector.load %arg7[%c0_15, %c0_16] : memref<1x128xf32, #tpu.memory_space<vmem>>, vector<1x128xf32>
    %18 = vector.broadcast %17 : vector<1x128xf32> to vector<8x128xf32>
    %19 = arith.addf %16, %18 : vector<8x128xf32>
    %20 = math.tanh %19 : vector<8x128xf32>
    %c0_17 = arith.constant 0 : index
    %c0_18 = arith.constant 0 : index
    %21 = vector.load %arg8[%c0_17, %c0_18] : memref<8x128xf32, #tpu.memory_space<vmem>>, vector<8x128xf32>
    tpu.vector_store %arg8[%c0_17, %c0_18], %20 {strides = array<i32>} : memref<8x128xf32, #tpu.memory_space<vmem>>, vector<8x128xf32>,
    return
  }
  func.func @transform_0(%arg0: i32) -> (i32, i32) {
    %c0_i32 = arith.constant 0 : i32
    %c0_i32_0 = arith.constant 0 : i32
    return %arg0, %c0_i32 : i32, i32
  }
  func.func @transform_1(%arg0: i32) -> (i32, i32) {
    %c0_i32 = arith.constant 0 : i32
    %c0_i32_0 = arith.constant 0 : i32
    %c0_i32_1 = arith.constant 0 : i32
    return %c0_i32, %c0_i32_0 : i32, i32
  }
  func.func @transform_2(%arg0: i32) -> (i32, i32) {
    %c0_i32 = arith.constant 0 : i32
    %c0_i32_0 = arith.constant 0 : i32
    %c0_i32_1 = arith.constant 0 : i32
    return %c0_i32, %c0_i32_0 : i32, i32
  }
  func.func @transform_3(%arg0: i32) -> (i32, i32) {
    %c0_i32 = arith.constant 0 : i32
    %c0_i32_0 = arith.constant 0 : i32
    %c0_i32_1 = arith.constant 0 : i32
    return %c0_i32, %c0_i32_0 : i32, i32
  }
  func.func @transform_4(%arg0: i32) -> (i32, i32) {
    %c0_i32 = arith.constant 0 : i32
    %c0_i32_0 = arith.constant 0 : i32
    %c0_i32_1 = arith.constant 0 : i32
    return %c0_i32, %c0_i32_0 : i32, i32
  }
  func.func @transform_5(%arg0: i32) -> (i32, i32) {
    %c0_i32 = arith.constant 0 : i32
    %c0_i32_0 = arith.constant 0 : i32
    %c0_i32_1 = arith.constant 0 : i32
    return %c0_i32, %c0_i32_0 : i32, i32
  }
  func.func @transform_6(%arg0: i32) -> (i32, i32) {
    %c0_i32 = arith.constant 0 : i32
    %c0_i32_0 = arith.constant 0 : i32
    %c0_i32_1 = arith.constant 0 : i32
    return %c0_i32, %c0_i32_0 : i32, i32
  }
  func.func @transform_7(%arg0: i32) -> (i32, i32) {
    %c0_i32 = arith.constant 0 : i32
    %c0_i32_0 = arith.constant 0 : i32
    return %arg0, %c0_i32 : i32, i32
  }
}

</mosaic_0001>

<bundles_post_ra>
// kernel: tpu_custom_call.1
= control target key start
LH: loop header
LB: loop body
LE: loop exit
PB: predicated region body
PF: predicated region fallthrough
CT: control target
= control target key end

     0   :  { %v475_v2 = vmov 0.0|0.0   ;;  %vm476_vm0 = vmmov 0   ;;  %v477_v4 = vmov 0.0   ;;  %vm37_vm1 = vcmask 130048   ;;  %s637_s0 = inlined_call_operand.vmem [shape: f32[8,16], index: 0, kind: input, shape index: {}]   ;;  %s638_s1 = inlined_call_operand.vmem [shape: f32[16,128], index: 1, kind: input, shape index: {}]   ;;  %s639_s2 = inlined_call_operand.vmem [shape: f32[1,128], index: 2, kind: input, shape index: {}]   ;;  %s640_s3 = inlined_call_operand.vmem [shape: f32[128,64], index: 3, kind: input, shape index: {}]   ;;  %s641_s4 = inlined_call_operand.vmem [shape: f32[1,64], index: 4, kind: input, shape index: {}]   ;;  %s642_s5 = inlined_call_operand.vmem [shape: f32[64,128], index: 5, kind: input, shape index: {}]   ;;  %s643_s6 = inlined_call_operand.vmem [shape: f32[1,128], index: 6, kind: input, shape index: {}]   ;;  %s644_s7 = inlined_call_operand.hbm [shape: f32[8,128], index: 7, kind: output, shape index: {}]  }
   0x1   :  { %v28_v0 = vld [vmem:[%s638_s1] sm:$0xff]  ;;  %v29_v1 = vld [vmem:[%s638_s1 + $0x8] sm:$0xff]  ;;  %406 = vmatprep.subr.bf16.mxu0 %v475_v2  ;;  %349 = vmatprep.mubr.msk.f32.mxu0 %vm476_vm0, %v477_v4  ;;  %v114_v7 = vld [vmem:[%s640_s3 + $0x10] sm:$0xff] }
   0x2   :  { %v407_v3 = vpack.c.bf16 %v29_v1, %v28_v0  ;;  %v112_v5 = vld [vmem:[%s640_s3] sm:$0xff]  ;;  %v113_v6 = vld [vmem:[%s640_s3 + $0x8] sm:$0xff]  ;;  %409 = vmatprep.subr.bf16.mxu1 %v475_v2  ;;  %v115_v9 = vld [vmem:[%s640_s3 + $0x18] sm:$0xff]  ;;  %384 = vmatprep.mubr.msk.f32.mxu1 %vm476_vm0, %v477_v4 }
   0x3   :  { %v410_v8 = vpack.c.bf16 %v113_v6, %v112_v5  ;;  %v27_v10 = vld [vmem:[%s637_s0] sm:$0xff]  ;;  %v413_v11 = vpack.c.bf16 %v115_v9, %v114_v7  ;;  %v117_v13 = vld [vmem:[%s640_s3 + $0x28] sm:$0xff] }
   0x4   :  { %408 = vmatpush3.bf16.msra.mxu0 %v407_v3  ;;  %v116_v12 = vld [vmem:[%s640_s3 + $0x20] sm:$0xff] }
   0x5   :  { %411 = vmatpush3.bf16.msra.mxu1 %v410_v8  ;;  %433 = vmatprep.subr.bf16.mxu0 %v475_v2 }
   0x6   :  { %412 = vmatprep.subr.bf16.mxu1 %v475_v2 }
   0x7   :  { %350 = vmatmul.mubr.msk.f32.vlgmr.msra.gmra.mrb[0].mxu0 %vm37_vm1, %v27_v10 }
   0x8   :  { %12 = vsyncpa [#allocation3], 0  ;;  %403 = vmatprep.mubr.msk.f32.mxu0 %vm476_vm0, %v477_v4  ;;  %v416_v14 = vpack.c.bf16 %v117_v13, %v116_v12  ;;  %v118_v15 = vld [vmem:[%s640_s3 + $0x30] sm:$0xff]  ;;  %v119_v16 = vld [vmem:[%s640_s3 + $0x38] sm:$0xff]  ;;  %vm221_vm2 = vcmask 523264  }
   0x9   :  { %414 = vmatpush3.bf16.msra.mxu1 %v413_v11  ;;  %v419_v17 = vpack.c.bf16 %v119_v16, %v118_v15  ;;  %v120_v18 = vld [vmem:[%s640_s3 + $0x40] sm:$0xff]  ;;  %v121_v19 = vld [vmem:[%s640_s3 + $0x48] sm:$0xff]  ;;  %v122_v21 = vld [vmem:[%s640_s3 + $0x50] sm:$0xff] }
   0xa   :  { %415 = vmatprep.subr.bf16.mxu1 %v475_v2  ;;  %v422_v20 = vpack.c.bf16 %v121_v19, %v120_v18  ;;  %v123_v22 = vld [vmem:[%s640_s3 + $0x58] sm:$0xff]  ;;  %v124_v24 = vld [vmem:[%s640_s3 + $0x60] sm:$0xff]  ;;  %v125_v25 = vld [vmem:[%s640_s3 + $0x68] sm:$0xff] }
   0xb   :  { %v425_v23 = vpack.c.bf16 %v123_v22, %v122_v21  ;;  %v428_v26 = vpack.c.bf16 %v125_v25, %v124_v24  ;;  %v126_v27 = vld [vmem:[%s640_s3 + $0x70] sm:$0xff]  ;;  %v127_v28 = vld [vmem:[%s640_s3 + $0x78] sm:$0xff]  ;;  %v206_v30 = vld [vmem:[%s642_s5] sm:$0xff] }
   0xc   :  { %v431_v29 = vpack.c.bf16 %v127_v28, %v126_v27  ;;  %v207_v31 = vld [vmem:[%s642_s5 + $0x8] sm:$0xff]  ;;  %v208_v32 = vld [vmem:[%s642_s5 + $0x10] sm:$0xff]  ;;  %v209_v34 = vld [vmem:[%s642_s5 + $0x18] sm:$0xff] }
   0xd   :  { %417 = vmatpush3.bf16.msra.mxu1 %v416_v14  ;;  %v434_v33 = vpack.c.bf16 %v207_v31, %v206_v30  ;;  %v437_v35 = vpack.c.bf16 %v209_v34, %v208_v32  ;;  %v210_v36 = vld [vmem:[%s642_s5 + $0x20] sm:$0xff]  ;;  %v211_v37 = vld [vmem:[%s642_s5 + $0x28] sm:$0xff]  ;;  %v212_v44 = vld [vmem:[%s642_s5 + $0x30] sm:$0xff] }
   0xe   :  { %418 = vmatprep.subr.bf16.mxu1 %v475_v2  ;;  %v440_v38 = vpack.c.bf16 %v211_v37, %v210_v36  ;;  %v311_v39 = vld [vmem:[%s639_s2] ss:$0 sm:$0xff]  ;;  %v213_v45 = vld [vmem:[%s642_s5 + $0x38] sm:$0xff]  ;;  %s478_s5 = smov [#allocation2]  }
   0xf   :  { %435 = vmatpush3.bf16.msra.mxu0 %v434_v33  ;;  %v443_v46 = vpack.c.bf16 %v213_v45, %v212_v44  ;;  %v313_v47 = vld [vmem:[%s641_s4] ss:$0 sm:$0xff]  ;;  %s303_s9 = sshll.u32 %s478_s5, 4  ;;  %s304_s9 = int_to_ptr.vmem [resolvable:$true] %s303_s9 }
  0x10   :  { %436 = vmatprep.subr.bf16.mxu0 %v475_v2  ;;  %v314_v52 = vld [vmem:[%s643_s6] ss:$0 sm:$0xff]  ;;  %s451_s4 = scalar_lea.vmem %s304_s9, 128  ;;  %p456_p1 = scmp.lt.s32.totalorder %s304_s9, %s304_s9 }
  0x11   :  { %420 = vmatpush3.bf16.msra.mxu1 %v419_v17  ;;  %p452_p0 = scmp.ne.s32.totalorder %s304_s9, %s451_s4  ;;  %p457_p2 = scmp.lt.s32.totalorder %s451_s4, %s451_s4 }
  0x12   :  { %421 = vmatprep.subr.bf16.mxu1 %v475_v2 }
  0x13   :  { %438 = vmatpush3.bf16.msra.mxu0 %v437_v35  ;;  %p458_p3 = por %p457_p2, %p456_p1 }
  0x14   :  { %439 = vmatprep.subr.bf16.mxu0 %v475_v2 }
  0x15   :  { %423 = vmatpush3.bf16.msra.mxu1 %v422_v20  ;;  %p459_p4 = pnand %p458_p3, %p452_p0 }
  0x16   :  { %424 = vmatprep.subr.bf16.mxu1 %v475_v2 }
  0x17   :  { %441 = vmatpush3.bf16.msra.mxu0 %v440_v38 }
  0x18   :  { %442 = vmatprep.subr.bf16.mxu0 %v475_v2 }
  0x19   :  { %426 = vmatpush3.bf16.msra.mxu1 %v425_v23 }
  0x1a   :  { %427 = vmatprep.subr.bf16.mxu1 %v475_v2 }
  0x1b   :  { %444 = vmatpush3.bf16.msra.mxu0 %v443_v46 }
  0x1d   :  { %429 = vmatpush3.bf16.msra.mxu1 %v428_v26 }
  0x1e   :  { %430 = vmatprep.subr.bf16.mxu1 %v475_v2 }
  0x21   :  { %432 = vmatpush3.bf16.msra.mxu1 %v431_v29 }
  0xda   :  { %v107_v40 = vpop.f32.mrb[0].mxu0 }
  0xdb   :  { %v108_v41 = vadd.f32 %v311_v39, %v107_v40  ;;  %v351_v42 = vpop.f32.mrb[1].mxu0 }
  0xdd   :  { %v111_v43 = vmax.f32 %v108_v41, 0.0 }
  0xdf   :  { %385 = vmatmul.mubr.f32.vlgmr.msra.gmra.mrb[0].mxu1 %v111_v43 }
 0x1b2   :  { %v201_v48 = vpop.f32.mrb[0].mxu1 }
 0x1b3   :  { %v202_v49 = vadd.f32 %v313_v47, %v201_v48  ;;  %v386_v50 = vpop.f32.mrb[1].mxu1 }
 0x1b5   :  { %v205_v51 = vmax.f32 %v202_v49, 0.0 }
 0x1b7   :  { %404 = vmatmul.mubr.msk.f32.vlgmr.msra.gmra.mrb[2].mxu0 %vm221_vm2, %v205_v51 }
 0x28a   :  { %v291_v53 = vpop.f32.mrb[2].mxu0 }
 0x28b   :  { %v292_v54 = vadd.f32 %v314_v52, %v291_v53  ;;  %v405_v55 = vpop.f32.mrb[3].mxu0 }
 0x28d   :  { %449 = vtanh.f32 %v292_v54 }
 0x297   :  { %v450_v56 = vpop.eup %449 }
 0x298   :  { %296 = vst [vmem:[#allocation2] sm:$0xff] %v450_v56 }
 0x299   :  { %462 = shalt.err (!%p459_p4)
}
 0x29a   :  { %s463_s6 = scalar_lea.hbm %s644_s7, 128 }
 0x29b   :  { %p464_p5 = scmp.ne.s32.totalorder %s644_s7, %s463_s6  ;;  %p467_p6 = scmp.lt.u32.totalorder %s463_s6, %s644_s7 }
 0x29d   :  { %p469_p7 = pnand %p467_p6, %p464_p5 }
 0x29f   :  { %472 = shalt.err (!%p469_p7)
}
 0x2a0   :  { %306 = dma.vmem_to_hbm [thread:$0]  %s304_s9, 128, %s644_s7, [#allocation3]  }
 0x2a1   :  { %473 = dma.done.wait [#allocation3], 128  }
 0x2a2   :  { %474 = vsyncadd [#allocation3], 4294967168 }
 0x2a3   :  { %310 = vsyncpa [#allocation3], 1 }

</bundles_post_ra>
